<compile_context>
chip_gen: v7x
topology: tpu7x:2x2x1
jax: 0.10.0
libtpu: 0.0.40
codegen_flags: <defaults>
</compile_context>

<pallas_src>
import math

import jax
import jax.numpy as jnp
from jax.experimental import pallas as pl
from jax.experimental.pallas import tpu as pltpu


def _make_conv_silu_kernel(n_in):
    """Pointwise conv (channel contraction) + SiLU on a (C, TS) spatial tile."""

    def kernel(x_ref, w_ref, b_ref, o_ref):
        x = x_ref[...].astype(jnp.float32)          # (C, TS)
        w = w_ref[...].astype(jnp.float32)          # (O, C)
        b = b_ref[...].astype(jnp.float32)          # (O, 1)
        if n_in <= 8:
            # K is tiny: a padded MXU contraction (K padded to 128/256) is pure
            # waste.  Unrolled outer-product accumulation on the VPU instead.
            acc = w[:, 0:1] * x[0:1, :]             # (O, TS)
            for c in range(1, n_in):
                acc = acc + w[:, c:c + 1] * x[c:c + 1, :]
            y = acc + b
        else:
            y = jnp.dot(w, x, preferred_element_type=jnp.float32) + b
        o_ref[...] = (y * jax.nn.sigmoid(y)).astype(o_ref.dtype)

    return kernel


def _pick_spatial_tile(s, max_tile=2048):
    """Largest spatial tile <= max_tile that divides S (multiple of 128), else S."""
    if s <= max_tile:
        return s
    start = max_tile - (max_tile % 128)
    for t in range(start, 127, -128):
        if s % t == 0:
            return t
    return s


def pixel_shuffle_upsample(x, weight, bias):
    """Forward of PixelShuffleUpsample.

    x      : (B, C, F, H, W)
    weight : (4*C_out, C)   -- the 1x1x1 Conv3d weight with trailing 1-dims dropped
    bias   : (4*C_out,)
    returns: (B, C_out, F, 2H, 2W)
    """
    B, C, Fr, H, W = x.shape
    O = weight.shape[0]
    assert O % 4 == 0
    c_out = O // 4
    S = Fr * H * W

    x_flat = x.reshape(B, C, S)                     # contiguous view, no copy
    w2 = weight.astype(jnp.float32)
    b2 = bias.reshape(O, 1).astype(jnp.float32)

    TS = _pick_spatial_tile(S)
    grid = (B, S // TS)

    y = pl.pallas_call(
        _make_conv_silu_kernel(C),
        out_shape=jax.ShapeDtypeStruct((B, O, S), x.dtype),
        grid=grid,
        in_specs=[
            pl.BlockSpec((None, C, TS), lambda b, s: (b, 0, s)),
            pl.BlockSpec((O, C), lambda b, s: (0, 0)),
            pl.BlockSpec((O, 1), lambda b, s: (0, 0)),
        ],
        out_specs=pl.BlockSpec((None, O, TS), lambda b, s: (b, 0, s)),
        compiler_params=pltpu.CompilerParams(
            dimension_semantics=("parallel", "parallel")),
    )(x_flat, w2, b2)

    # y is the conv+SiLU output in PyTorch channel layout (B, 4*C_out, F, H, W),
    # with channel index q = 4*c + 2*i + j.  PixelShuffle(2) per frame:
    #     out[b, c, f, 2h+i, 2w+j] = y[b, 4c+2i+j, f, h, w]
    y = y.reshape(B, c_out, 2, 2, Fr, H, W)          # (b, c, i, j, f, h, w)
    y = jnp.transpose(y, (0, 1, 4, 5, 2, 6, 3))      # (b, c, f, h, i, w, j)
    return y.reshape(B, c_out, Fr, 2 * H, 2 * W)


def init_psu_params(key, dim, dim_out=None):
    """Parameters mimicking PixelShuffleUpsample.init_conv_ (kaiming base filter
    repeated 'o ... -> (o 4) ...').  A small non-zero bias is used (the module
    zero-inits it) so the kernel's bias path is actually exercised."""
    dim_out = dim if dim_out is None else dim_out
    k_w, k_b = jax.random.split(key)
    fan_in = dim
    bound = math.sqrt(6.0 / fan_in)
    w_base = jax.random.uniform(k_w, (dim_out, dim), jnp.float32, -bound, bound)
    weight = jnp.repeat(w_base, 4, axis=0)           # (4*dim_out, dim)
    bias = 0.1 * jax.random.normal(k_b, (4 * dim_out,), jnp.float32)
    return weight, bias


def _reference(x, weight, bias):
    """Pure-JAX reference (independent formulation of the pixel shuffle)."""
    B, C, Fr, H, W = x.shape
    O = weight.shape[0]
    c_out = O // 4
    y = jnp.einsum('bcfhw,oc->bofhw', x.astype(jnp.float32),
                   weight.astype(jnp.float32))
    y = y + bias.astype(jnp.float32)[None, :, None, None, None]
    y = y * jax.nn.sigmoid(y)
    y = y.reshape(B, c_out, 2, 2, Fr, H, W)
    out = jnp.zeros((B, c_out, Fr, 2 * H, 2 * W), jnp.float32)
    out = out.at[:, :, :, 0::2, 0::2].set(y[:, :, 0, 0])
    out = out.at[:, :, :, 0::2, 1::2].set(y[:, :, 0, 1])
    out = out.at[:, :, :, 1::2, 0::2].set(y[:, :, 1, 0])
    out = out.at[:, :, :, 1::2, 1::2].set(y[:, :, 1, 1])
    return out.astype(x.dtype)


if __name__ == "__main__":
    # Small shapes consistent with the module: batch=2, dim=4, frames=3, 16x16.
    B, dim, Fr, H, W = 2, 4, 3, 16, 16
    key = jax.random.PRNGKey(0)
    k_x, k_p = jax.random.split(key)
    x = jax.random.normal(k_x, (B, dim, Fr, H, W), jnp.float32)
    weight, bias = init_psu_params(k_p, dim)         # dim_out defaults to dim

    out = jax.block_until_ready(pixel_shuffle_upsample(x, weight, bias))
    ref = jax.block_until_ready(_reference(x, weight, bias))

    assert out.shape == (B, dim, Fr, 2 * H, 2 * W), out.shape
    assert out.dtype == x.dtype
    assert jnp.allclose(out, ref, rtol=1e-5, atol=1e-5), \
        float(jnp.max(jnp.abs(out - ref)))

    print("KERNEL_OK")
</pallas_src>

<mosaic_0001>
module attributes {stable_mosaic.version = 11 : i64} {
  func.func @kernel(%arg0: i32, %arg1: i32, %arg2: memref<1x4x768xf32, #tpu.memory_space<vmem>>, %arg3: memref<16x4xf32, #tpu.memory_space<vmem>>, %arg4: memref<16x1xf32, #tpu.memory_space<vmem>>, %arg5: memref<1x16x768xf32, #tpu.memory_space<vmem>>) attributes {dimension_semantics = [#tpu.dimension_semantics<parallel>, #tpu.dimension_semantics<parallel>], iteration_bounds = array<i64: 2, 1>, scalar_prefetch = 0 : i64, scratch_operands = 0 : i64, tpu.core_type = #tpu.core_type<tc>, window_params = [{transform_indices = @transform_0, window_bounds = array<i64: 1, 4, 768>}, {pipeline_mode = #tpu.pipeline_mode<synchronous>, transform_indices = @transform_1, window_bounds = array<i64: 16, 4>}, {pipeline_mode = #tpu.pipeline_mode<synchronous>, transform_indices = @transform_2, window_bounds = array<i64: 16, 1>}, {transform_indices = @transform_3, window_bounds = array<i64: 1, 16, 768>}]} {
    %c0 = arith.constant 0 : index
    %c0_0 = arith.constant 0 : index
    %c0_1 = arith.constant 0 : index
    %0 = vector.load %arg2[%c0, %c0_0, %c0_1] : memref<1x4x768xf32, #tpu.memory_space<vmem>>, vector<1x4x768xf32>
    %1 = vector.shape_cast %0 : vector<1x4x768xf32> to vector<4x768xf32>
    %c0_2 = arith.constant 0 : index
    %c0_3 = arith.constant 0 : index
    %2 = vector.load %arg3[%c0_2, %c0_3] : memref<16x4xf32, #tpu.memory_space<vmem>>, vector<16x4xf32>
    %c0_4 = arith.constant 0 : index
    %c0_5 = arith.constant 0 : index
    %3 = vector.load %arg4[%c0_4, %c0_5] : memref<16x1xf32, #tpu.memory_space<vmem>>, vector<16x1xf32>
    %4 = vector.extract_strided_slice %2 {offsets = [0, 0], sizes = [16, 1], strides = [1, 1]} : vector<16x4xf32> to vector<16x1xf32>
    %5 = vector.extract_strided_slice %1 {offsets = [0, 0], sizes = [1, 768], strides = [1, 1]} : vector<4x768xf32> to vector<1x768xf32>
    %6 = vector.broadcast %4 : vector<16x1xf32> to vector<16x768xf32>
    %7 = vector.broadcast %5 : vector<1x768xf32> to vector<16x768xf32>
    %8 = arith.mulf %6, %7 : vector<16x768xf32>
    %9 = vector.extract_strided_slice %2 {offsets = [0, 1], sizes = [16, 1], strides = [1, 1]} : vector<16x4xf32> to vector<16x1xf32>
    %10 = vector.extract_strided_slice %1 {offsets = [1, 0], sizes = [1, 768], strides = [1, 1]} : vector<4x768xf32> to vector<1x768xf32>
    %11 = vector.broadcast %9 : vector<16x1xf32> to vector<16x768xf32>
    %12 = vector.broadcast %10 : vector<1x768xf32> to vector<16x768xf32>
    %13 = arith.mulf %11, %12 : vector<16x768xf32>
    %14 = arith.addf %8, %13 : vector<16x768xf32>
    %15 = vector.extract_strided_slice %2 {offsets = [0, 2], sizes = [16, 1], strides = [1, 1]} : vector<16x4xf32> to vector<16x1xf32>
    %16 = vector.extract_strided_slice %1 {offsets = [2, 0], sizes = [1, 768], strides = [1, 1]} : vector<4x768xf32> to vector<1x768xf32>
    %17 = vector.broadcast %15 : vector<16x1xf32> to vector<16x768xf32>
    %18 = vector.broadcast %16 : vector<1x768xf32> to vector<16x768xf32>
    %19 = arith.mulf %17, %18 : vector<16x768xf32>
    %20 = arith.addf %14, %19 : vector<16x768xf32>
    %21 = vector.extract_strided_slice %2 {offsets = [0, 3], sizes = [16, 1], strides = [1, 1]} : vector<16x4xf32> to vector<16x1xf32>
    %22 = vector.extract_strided_slice %1 {offsets = [3, 0], sizes = [1, 768], strides = [1, 1]} : vector<4x768xf32> to vector<1x768xf32>
    %23 = vector.broadcast %21 : vector<16x1xf32> to vector<16x768xf32>
    %24 = vector.broadcast %22 : vector<1x768xf32> to vector<16x768xf32>
    %25 = arith.mulf %23, %24 : vector<16x768xf32>
    %26 = arith.addf %20, %25 : vector<16x768xf32>
    %27 = vector.broadcast %3 : vector<16x1xf32> to vector<16x768xf32>
    %28 = arith.addf %26, %27 : vector<16x768xf32>
    %29 = arith.negf %28 : vector<16x768xf32>
    %30 = math.exp %29 : vector<16x768xf32>
    %cst = arith.constant 1.000000e+00 : f32
    %31 = vector.broadcast %cst : f32 to vector<16x768xf32>
    %32 = arith.addf %31, %30 : vector<16x768xf32>
    %33 = arith.divf %31, %32 : vector<16x768xf32>
    %34 = arith.mulf %28, %33 : vector<16x768xf32>
    %c0_6 = arith.constant 0 : index
    %c0_7 = arith.constant 0 : index
    %c0_8 = arith.constant 0 : index
    %35 = vector.load %arg5[%c0_6, %c0_7, %c0_8] : memref<1x16x768xf32, #tpu.memory_space<vmem>>, vector<1x16x768xf32>
    %36 = vector.shape_cast %35 : vector<1x16x768xf32> to vector<16x768xf32>
    %37 = vector.shape_cast %34 : vector<16x768xf32> to vector<1x16x768xf32>
    tpu.vector_store %arg5[%c0_6, %c0_7, %c0_8], %37 {strides = array<i32>} : memref<1x16x768xf32, #tpu.memory_space<vmem>>, vector<1x16x768xf32>,
    return
  }
  func.func @transform_0(%arg0: i32, %arg1: i32) -> (i32, i32, i32) {
    %c0_i32 = arith.constant 0 : i32
    %c0_i32_0 = arith.constant 0 : i32
    return %arg0, %c0_i32, %arg1 : i32, i32, i32
  }
  func.func @transform_1(%arg0: i32, %arg1: i32) -> (i32, i32) {
    %c0_i32 = arith.constant 0 : i32
    %c0_i32_0 = arith.constant 0 : i32
    %c0_i32_1 = arith.constant 0 : i32
    return %c0_i32, %c0_i32_0 : i32, i32
  }
  func.func @transform_2(%arg0: i32, %arg1: i32) -> (i32, i32) {
    %c0_i32 = arith.constant 0 : i32
    %c0_i32_0 = arith.constant 0 : i32
    %c0_i32_1 = arith.constant 0 : i32
    return %c0_i32, %c0_i32_0 : i32, i32
  }
  func.func @transform_3(%arg0: i32, %arg1: i32) -> (i32, i32, i32) {
    %c0_i32 = arith.constant 0 : i32
    %c0_i32_0 = arith.constant 0 : i32
    return %arg0, %c0_i32, %arg1 : i32, i32, i32
  }
}

</mosaic_0001>

<bundles_post_ra>
// kernel: tpu_custom_call.1
= control target key start
LH: loop header
LB: loop body
LE: loop exit
PB: predicated region body
PF: predicated region fallthrough
CT: control target
= control target key end

     0   :  { %8 = vsyncpa [#allocation3], 0  ;;  %s1377_s0 = inlined_call_operand.hbm [shape: f32[2,4,768], index: 0, kind: input, shape index: {}]   ;;  %s1378_s1 = inlined_call_operand.vmem [shape: f32[16,4], index: 1, kind: input, shape index: {}]   ;;  %s1379_s2 = inlined_call_operand.vmem [shape: f32[16,1], index: 2, kind: input, shape index: {}]   ;;  %s1380_s3 = inlined_call_operand.hbm [shape: f32[2,16,768], index: 3, kind: output, shape index: {}]  }
   0x1   :  { %10 = vsyncpa [#allocation3 + $0x1], 0 }
   0x2   :  { %11 = vsyncpa [#allocation4], 0 }
   0x3   :  { %13 = vsyncpa [#allocation4 + $0x1], 0  ;;  %s1064_s12 = smov 0   ;;  %s1066_s13 = smov 0  }
   0x4   :  { %s1068_s14 = smov 0   ;;  %s1070_s15 = smov 0  }
   0x5   :  { %s1072_s16 = smov 0   ;;  %s1074_s17 = smov 0  }
   0x6 LB: > { %s772_s18 = sadd.s32 4294967295, %s1034_s17   ;;  %s773_s19 = sadd.s32 4294967294, %s1034_s17   ;;  %s1034_s17 = sphi %s1074_s17, %s19_s17   ;;  %s1030_s16 = sphi %s1072_s16, %s1395_s16   ;;  %s1026_s15 = sphi %s1070_s15, %s1394_s15   ;;  %s1022_s14 = sphi %s1068_s14, %s1393_s14   ;;  %s1018_s13 = sphi %s1066_s13, %s1392_s13   ;;  %s1014_s12 = sphi %s1064_s12, %s1391_s12  }
   0x7   : > { %s31_s20 = sadd.s32 1, %s1030_s16  ;;  %s40_s21 = sadd.s32 1, %s1022_s14 }
   0x8   : > { %p33_p0 = scmp.ge.s32.totalorder %s31_s20, 2  ;;  %p47_p1 = scmp.ne.s32.totalorder %s1022_s14, %s1018_s13 }
   0x9   : > { %p48_p2 = scmp.eq.s32.totalorder %s1034_s17, 0  ;;  %p53_p3 = scmp.ne.s32.totalorder %s1018_s13, %s1014_s12 }
   0xa   : > { %s1397_s20 = smov (%p33_p0, %s31_s20), 0  ;;  %p54_p5 = scmp.eq.s32.totalorder %s772_s18, 0 }
   0xb   : > { %p1105_p4 = por %p48_p2, %p47_p1  ;;  %s35_s23 = ssub.s32 %s1030_s16, %s1397_s20 }
   0xc   : > { %p121_p6 = scmp.eq.s32.totalorder %s772_s18, 1  ;;  %p38_p7 = scmp.eq.s32.totalorder %s35_s23, 0 }
   0xd   : > { %p1111_p8 = por %p54_p5, %p53_p3  ;;  %p127_p10 = scmp.eq.s32.totalorder %s773_s19, 1 }
   0xe   : > { %p1115_p9 = por %p121_p6, %p47_p1  ;;  %p810_p13 = scmp.lt.s32.totalorder %s1034_s17, 2 }
   0xf   : > { %s1120_s26 = scalar_select %p38_p7, %s1022_s14, %s40_s21  }
  0x10   : > { %s1384_s25 = scalar_select %p1115_p9, 1, 0 }
  0x11   : > { %p1122_p11 = por %p127_p10, %p53_p3  ;;  %s153_s28 = sand.u32 1, %s1022_s14  }
  0x12   : > { %s793_s29 = smul.u32 24, %s153_s28  ;;  %p1132_p0 = pnand %p810_p13, %p1105_p4 }
  0x13   : > { %s1385_s27 = scalar_select %p1122_p11, 1, 0 }
  0x14   : > { %s794_s30 = smul.u32 384, %s1030_s16  ;;  %s157_s8 = scalar_lea.vmem [#allocation2], %s793_s29 }
  0x15   : > { %s167_s9 = sshll.u32 %s157_s8, 4  ;;  %s154_s10 = scalar_lea.sflag [#allocation3], %s153_s28  ;;  %s1142_s9 = int_to_ptr.vmem [resolvable:$true] %s167_s9 }
  0x16   : > { %s1140_s7 = scalar_lea.hbm %s1377_s0, %s794_s30  ;;  %p924_p3 = pneg %p1132_p0 }
  0x17   : > { %s922_s11 = scalar_lea.hbm %s1140_s7, 384  ;;  %s927_s21 = scalar_lea.hbm %s1377_s0, 768 }
  0x18   : > { %p923_p2 = scmp.ne.s32.totalorder %s1140_s7, %s922_s11  ;;  %p928_p6 = scmp.lt.u32.totalorder %s1140_s7, %s1377_s0 }
  0x19   : > { %p929_p7 = scmp.lt.u32.totalorder %s927_s21, %s922_s11  ;;  %p931_p13 = scmp.lt.u32.totalorder %s922_s11, %s1140_s7 }
  0x1a   : > { %p925_p4 = pnand %p924_p3, %p923_p2 }
  0x1b   : > { %p930_p10 = por %p929_p7, %p928_p6 }
  0x1c   : > { %p926_p5 = pneg %p925_p4 }
  0x1d   : > { %p932_p12 = por %p931_p13, %p930_p10 }
  0x1f   : > { %p933_p1 = pnand %p932_p12, %p926_p5 }
  0x21   : > { %936 = shalt.err (!%p933_p1)
}
  0x22   : > { %s937_s28 = scalar_lea.vmem %s1142_s9, 384  ;;  %s1036_s29 = smov [#allocation2]  }
  0x23   : > { %p938_p2 = scmp.ne.s32.totalorder %s1142_s9, %s937_s28  ;;  %s942_s30 = sshll.u32 %s1036_s29, 4  ;;  %s943_s30 = int_to_ptr.vmem [resolvable:$false] %s942_s30 }
  0x24   : > { %s944_s5 = scalar_lea.vmem %s943_s30, 768  ;;  %p945_p9 = scmp.lt.s32.totalorder %s1142_s9, %s943_s30 }
  0x25   : > { %p940_p4 = pnand %p938_p2, %p924_p3  ;;  %p946_p6 = scmp.lt.s32.totalorder %s944_s5, %s937_s28 }
  0x27   : > { %p941_p11 = pneg %p940_p4  ;;  %p947_p7 = por %p946_p6, %p945_p9 }
  0x29   : > { %p948_p10 = pnand %p947_p7, %p941_p11 }
  0x2b   : > { %951 = shalt.err (!%p948_p10)
}
  0x2c   : > { %805 = dma.hbm_to_vmem [thread:$0]  (!%p1132_p0), %s1140_s7, 384, %s1142_s9, %s154_s10  }
  0x2d   : > { %p172_p12 = scmp.lt.s32.totalorder %s1034_s17, 3  ;;  %p1387_p1 = scmp.ge.s32.totalorder %s1034_s17, 1 }
  0x2f   : > { %p173_p3 = pnand %p1387_p1, %p172_p12 }
  0x30   : > { %s1173_s6 = sand.u32 (!%p173_p3), 1, %s1018_s13  }
  0x31   : > { %176 = sbr.rel (%p173_p3) target bundleno = 262 (0x106), region = 32  ;;  %s179_s11 = scalar_lea.sflag (!%p173_p3), [#allocation3], %s1173_s6 }
  0x32   : > { %s795_s8 = smul.u32 (!%p173_p3), 24, %s1173_s6 }
  0x34   : > { %s1177_s18 = scalar_lea.vmem (!%p173_p3), [#allocation2], %s795_s8 }
  0x38   : > { %1005 = dma.done.wait (%p1111_p8), %s179_s11, 384  }
  0x39   : > { %1007 = vsyncadd (%p1111_p8), %s179_s11, 4294966912  ;;  %v1037_v0 = vmov 1   ;;  %v1038_v1 = vmov 0   ;;  %v210_v2 = vld [vmem:[%s1378_s1] sm:$0xff]  ;;  %v211_v3 = vld [vmem:[%s1378_s1 + $0x8] sm:$0xff]  ;;  %v1039_v4 = vmov 2   ;;  %v227_v8 = vlaneseq }
  0x3a   : > { %867 = vset.pattern.permute.xlu1 %v1037_v0  ;;  %866 = vset.pattern.permute.xlu0 %v1038_v1  ;;  %v1040_v5 = vmov 3   ;;  %v212_v6 = vld [vmem:[%s1379_s2] sm:$0xff]  ;;  %v213_v7 = vld [vmem:[%s1379_s2 + $0x8] sm:$0xff]  ;;  %s796_s23 = smul.u32 96, %s1173_s6  ;;  %s670_s11 = scalar_lea.sflag [#allocation4], %s1173_s6 }
  0x3b   : > { %294 = vperm.xlu1 %867, %v210_v2   ;;  %216 = vperm.xlu0 %866, %v210_v2   ;;  %v228_v9 = vshrl.u32 %v227_v8, 7  ;;  %v207_v12 = vld [vmem:[%s1177_s18] sm:$0xff]  ;;  %v1197_v13 = vld [vmem:[%s1177_s18 + $0x8] sm:$0xff]  ;;  %v1200_v14 = vld [vmem:[%s1177_s18 + $0x10] sm:$0xff]  ;;  %s797_s29 = smul.u32 1536, %s1026_s15  ;;  %p1388_p9 = scmp.ne.s32.totalorder %s1384_s25, 0 }
  0x3c   : > { %s1298_s28 = scalar_lea.vmem [#allocation5], %s796_s23  ;;  %s1041_s4 = smov [#allocation5]  }
  0x3d   : > { %v303_v10 = vsub.s32 1, %v228_v9  ;;  %v307_v11 = vsub.s32 5, %v228_v9  ;;  %v229_v17 = vsub.s32 0, %v228_v9  ;;  %v233_v18 = vsub.s32 4, %v228_v9  ;;  %s685_s30 = sshll.u32 %s1298_s28, 4  ;;  %s1322_s8 = scalar_lea.hbm %s1380_s3, %s797_s29  ;;  %s1326_s30 = int_to_ptr.vmem [resolvable:$true] %s685_s30 }
  0x3e   : > { %v389_v23 = vsub.s32 2, %v228_v9  ;;  %v393_v24 = vsub.s32 6, %v228_v9  ;;  %v475_v32 = vsub.s32 3, %v228_v9  ;;  %v479_v40 = vsub.s32 7, %v228_v9  ;;  %s952_s18 = scalar_lea.vmem %s1326_s30, 1536  ;;  %s956_s7 = sshll.u32 %s1041_s4, 4  ;;  %s957_s7 = int_to_ptr.vmem [resolvable:$false] %s956_s7 }
  0x3f   : > { %298 = vperm.xlu1 %867, %v211_v3   ;;  %221 = vperm.xlu0 %866, %v211_v3   ;;  %v304_v15 = vrot.slane %v207_v12, %v303_v10  ;;  %v308_v16 = vrot.slane %v207_v12, %v307_v11  ;;  %v312_v19 = vrot.slane %v1197_v13, %v303_v10  ;;  %p953_p8 = scmp.ne.s32.totalorder %s1326_s30, %s952_s18  ;;  %s958_s9 = scalar_lea.vmem %s957_s7, 3072 }
  0x40   : > { %v316_v20 = vrot.slane %v1197_v13, %v307_v11  ;;  %v320_v21 = vrot.slane %v1200_v14, %v303_v10  ;;  %v324_v22 = vrot.slane %v1200_v14, %v307_v11  ;;  %v230_v27 = vrot.slane %v207_v12, %v229_v17  ;;  %p959_p5 = scmp.lt.s32.totalorder %s1326_s30, %s957_s7  ;;  %p960_p13 = scmp.lt.s32.totalorder %s958_s9, %s952_s18 }
  0x41   : > { %v1206_v25 = vrot.slane %v304_v15, %v303_v10  ;;  %v1208_v26 = vrot.slane %v308_v16, %v303_v10  ;;  %v234_v28 = vrot.slane %v207_v12, %v233_v18  ;;  %v342_v29 = vrot.slane %v312_v19, %v303_v10  ;;  %p954_p11 = pnand %p953_p8, %p1388_p9 }
  0x42   : > { %v346_v30 = vrot.slane %v316_v20, %v303_v10  ;;  %v350_v31 = vrot.slane %v320_v21, %v303_v10  ;;  %v238_v33 = vrot.slane %v1197_v13, %v229_v17  ;;  %v242_v34 = vrot.slane %v1197_v13, %v233_v18  ;;  %p961_p2 = por %p960_p13, %p959_p5 }
  0x43   : > { %869 = vset.pattern.permute.xlu1 %v1039_v4  ;;  %868 = vset.pattern.permute.xlu0 %v1039_v4  ;;  %v246_v35 = vrot.slane %v1200_v14, %v229_v17  ;;  %v250_v36 = vrot.slane %v1200_v14, %v233_v18  ;;  %v354_v37 = vrot.slane %v324_v22, %v303_v10  ;;  %p955_p0 = pneg %p954_p11 }
  0x44   : > { %384 = vperm.xlu1 %869, %v211_v3   ;;  %380 = vperm.xlu0 %868, %v210_v2   ;;  %v390_v38 = vrot.slane %v207_v12, %v389_v23  ;;  %v394_v39 = vrot.slane %v207_v12, %v393_v24  ;;  %v260_v41 = vrot.slane %v230_v27, %v229_v17 }
  0x45   : > { %v264_v42 = vrot.slane %v234_v28, %v229_v17  ;;  %v398_v43 = vrot.slane %v1197_v13, %v389_v23  ;;  %v402_v44 = vrot.slane %v1197_v13, %v393_v24  ;;  %v406_v45 = vrot.slane %v1200_v14, %v389_v23  ;;  %p962_p4 = pnand %p961_p2, %p955_p0 }
  0x46   : > { %v410_v46 = vrot.slane %v1200_v14, %v393_v24  ;;  %v476_v47 = vrot.slane %v207_v12, %v475_v32  ;;  %v484_v48 = vrot.slane %v1197_v13, %v475_v32  ;;  %v268_v49 = vrot.slane %v238_v33, %v229_v17 }
  0x47   : > { %v272_v50 = vrot.slane %v242_v34, %v229_v17  ;;  %v276_v51 = vrot.slane %v246_v35, %v229_v17  ;;  %v280_v52 = vrot.slane %v250_v36, %v229_v17  ;;  %v1219_v53 = vrot.slane %v390_v38, %v389_v23 }
  0x48   : > { %870 = vset.pattern.permute.xlu1 %v1040_v5  ;;  %871 = vset.pattern.permute.xlu0 %v1040_v5  ;;  %v1221_v54 = vrot.slane %v394_v39, %v389_v23  ;;  %v480_v55 = vrot.slane %v207_v12, %v479_v40  ;;  %v492_v56 = vrot.slane %v1200_v14, %v475_v32 }
  0x49   : > { %466 = vperm.xlu1 %870, %v210_v2   ;;  %470 = vperm.xlu0 %871, %v211_v3   ;;  %v428_v57 = vrot.slane %v398_v43, %v389_v23  ;;  %v432_v58 = vrot.slane %v402_v44, %v389_v23  ;;  %v488_v59 = vrot.slane %v1197_v13, %v479_v40 }
  0x4a   : > { %v496_v60 = vrot.slane %v1200_v14, %v479_v40  ;;  %v436_v63 = vrot.slane %v406_v45, %v389_v23  ;;  %v440_v0 = vrot.slane %v410_v46, %v389_v23  ;;  %v1228_v2 = vrot.slane %v484_v48, %v475_v32 }
  0x4b   : > { %v1232_v9 = vrot.slane %v480_v55, %v475_v32  ;;  %v1234_v10 = vrot.slane %v492_v56, %v475_v32  ;;  %v1236_v13 = vrot.slane %v488_v59, %v475_v32 }
  0x4c   : > { %v1238_v14 = vrot.slane %v496_v60, %v475_v32 }
  0x4d   : > { %872 = vset.pattern.permute.xlu1 %v1038_v1  ;;  %873 = vset.pattern.permute.xlu0 %v1038_v1  ;;  %v1226_v1 = vrot.slane %v476_v47, %v475_v32 }
  0x4e   : > { %553 = vperm.xlu1 %872, %v212_v6  }
  0x52   : > { %558 = vperm.xlu1 %872, %v213_v7  }
  0xba   : > { %v295_v61 = vpop.permute.xlu1 %294  ;;  %v217_v62 = vpop.permute.xlu0 %216 }
  0xbb   : > { %v355_v3 = vmul.f32 %v1206_v25, %v295_v61  ;;  %v356_v4 = vmul.f32 %v1208_v26, %v295_v61  ;;  %v357_v5 = vmul.f32 %v342_v29, %v295_v61  ;;  %v358_v6 = vmul.f32 %v346_v30, %v295_v61 }
  0xbc   : > { %v281_v7 = vmul.f32 %v260_v41, %v217_v62  ;;  %v282_v8 = vmul.f32 %v264_v42, %v217_v62  ;;  %v283_v11 = vmul.f32 %v268_v49, %v217_v62  ;;  %v284_v12 = vmul.f32 %v272_v50, %v217_v62 }
  0xbd   : > { %v359_v15 = vmul.f32 %v350_v31, %v295_v61  ;;  %v360_v16 = vmul.f32 %v354_v37, %v295_v61  ;;  %v285_v17 = vmul.f32 %v276_v51, %v217_v62  ;;  %v286_v18 = vmul.f32 %v280_v52, %v217_v62 }
  0xbe   : > { %v299_v19 = vpop.permute.xlu1 %298  ;;  %v222_v20 = vpop.permute.xlu0 %221  ;;  %v367_v21 = vadd.f32 %v355_v3, %v281_v7  ;;  %v368_v22 = vadd.f32 %v356_v4, %v282_v8  ;;  %v369_v23 = vadd.f32 %v357_v5, %v283_v11  ;;  %v370_v24 = vadd.f32 %v358_v6, %v284_v12 }
  0xbf   : > { %v361_v27 = vmul.f32 %v1206_v25, %v299_v19  ;;  %v362_v28 = vmul.f32 %v1208_v26, %v299_v19  ;;  %v363_v33 = vmul.f32 %v342_v29, %v299_v19  ;;  %v364_v34 = vmul.f32 %v346_v30, %v299_v19 }
  0xc0   : > { %v365_v35 = vmul.f32 %v350_v31, %v299_v19  ;;  %v366_v36 = vmul.f32 %v354_v37, %v299_v19  ;;  %v287_v32 = vmul.f32 %v260_v41, %v222_v20  ;;  %v288_v38 = vmul.f32 %v264_v42, %v222_v20 }
  0xc1   : > { %v289_v39 = vmul.f32 %v268_v49, %v222_v20  ;;  %v290_v40 = vmul.f32 %v272_v50, %v222_v20  ;;  %v291_v43 = vmul.f32 %v276_v51, %v222_v20  ;;  %v292_v44 = vmul.f32 %v280_v52, %v222_v20 }
  0xc2   : > { %v371_v45 = vadd.f32 %v359_v15, %v285_v17  ;;  %v372_v46 = vadd.f32 %v360_v16, %v286_v18  ;;  %v373_v47 = vadd.f32 %v361_v27, %v287_v32  ;;  %v374_v48 = vadd.f32 %v362_v28, %v288_v38 }
  0xc3   : > { %v385_v55 = vpop.permute.xlu1 %384  ;;  %v381_v56 = vpop.permute.xlu0 %380  ;;  %v375_v59 = vadd.f32 %v363_v33, %v289_v39  ;;  %v376_v25 = vadd.f32 %v364_v34, %v290_v40  ;;  %v377_v60 = vadd.f32 %v365_v35, %v291_v43  ;;  %v378_v26 = vadd.f32 %v366_v36, %v292_v44 }
  0xc4   : > { %v447_v29 = vmul.f32 %v1219_v53, %v385_v55  ;;  %v448_v30 = vmul.f32 %v1221_v54, %v385_v55  ;;  %v449_v31 = vmul.f32 %v428_v57, %v385_v55  ;;  %v450_v37 = vmul.f32 %v432_v58, %v385_v55 }
  0xc5   : > { %v451_v41 = vmul.f32 %v436_v63, %v385_v55  ;;  %v452_v42 = vmul.f32 %v440_v0, %v385_v55  ;;  %v441_v49 = vmul.f32 %v1219_v53, %v381_v56  ;;  %v442_v50 = vmul.f32 %v1221_v54, %v381_v56 }
  0xc6   : > { %v443_v51 = vmul.f32 %v428_v57, %v381_v56  ;;  %v444_v52 = vmul.f32 %v432_v58, %v381_v56  ;;  %v445_v61 = vmul.f32 %v436_v63, %v381_v56  ;;  %v446_v62 = vmul.f32 %v440_v0, %v381_v56 }
  0xc7   : > { %v453_v3 = vadd.f32 %v441_v49, %v367_v21  ;;  %v454_v4 = vadd.f32 %v442_v50, %v368_v22  ;;  %v459_v7 = vadd.f32 %v447_v29, %v373_v47  ;;  %v460_v8 = vadd.f32 %v448_v30, %v374_v48 }
  0xc8   : > { %v467_v5 = vpop.permute.xlu1 %466  ;;  %v471_v6 = vpop.permute.xlu0 %470  ;;  %v455_v11 = vadd.f32 %v443_v51, %v369_v23  ;;  %v456_v12 = vadd.f32 %v444_v52, %v370_v24  ;;  %v457_v15 = vadd.f32 %v445_v61, %v371_v45  ;;  %v458_v16 = vadd.f32 %v446_v62, %v372_v46 }
  0xc9   : > { %v527_v17 = vmul.f32 %v1226_v1, %v467_v5  ;;  %v528_v53 = vmul.f32 %v1232_v9, %v467_v5  ;;  %v529_v54 = vmul.f32 %v1228_v2, %v467_v5  ;;  %v530_v57 = vmul.f32 %v1236_v13, %v467_v5 }
  0xca   : > { %v531_v58 = vmul.f32 %v1234_v10, %v467_v5  ;;  %v532_v63 = vmul.f32 %v1238_v14, %v467_v5  ;;  %v533_v0 = vmul.f32 %v1226_v1, %v471_v6  ;;  %v534_v18 = vmul.f32 %v1232_v9, %v471_v6 }
  0xcb   : > { %v535_v19 = vmul.f32 %v1228_v2, %v471_v6  ;;  %v536_v20 = vmul.f32 %v1236_v13, %v471_v6  ;;  %v537_v21 = vmul.f32 %v1234_v10, %v471_v6  ;;  %v538_v22 = vmul.f32 %v1238_v14, %v471_v6 }
  0xcc   : > { %v539_v24 = vadd.f32 %v527_v17, %v453_v3  ;;  %v540_v27 = vadd.f32 %v528_v53, %v454_v4  ;;  %v541_v28 = vadd.f32 %v529_v54, %v455_v11  ;;  %v542_v33 = vadd.f32 %v530_v57, %v456_v12 }
  0xcd   : > { %v554_v23 = vpop.permute.xlu1 %553  ;;  %v543_v34 = vadd.f32 %v531_v58, %v457_v15  ;;  %v544_v35 = vadd.f32 %v532_v63, %v458_v16  ;;  %v461_v36 = vadd.f32 %v449_v31, %v375_v59  ;;  %v462_v32 = vadd.f32 %v450_v37, %v376_v25 }
  0xce   : > { %v1258_v1 = vadd.f32 %v554_v23, %v539_v24  ;;  %v1260_v9 = vadd.f32 %v554_v23, %v540_v27  ;;  %v1262_v2 = vadd.f32 %v554_v23, %v541_v28  ;;  %v1264_v13 = vadd.f32 %v554_v23, %v542_v33 }
  0xcf   : > { %v1266_v10 = vadd.f32 %v554_v23, %v543_v34  ;;  %v1268_v14 = vadd.f32 %v554_v23, %v544_v35  ;;  %v463_v38 = vadd.f32 %v451_v41, %v377_v60  ;;  %v464_v39 = vadd.f32 %v452_v42, %v378_v26 }
  0xd0   : > { %v778_v40 = vmul.f32 -1.442695, %v1258_v1  ;;  %v779_v43 = vmul.f32 -1.442695, %v1260_v9  ;;  %v780_v44 = vmul.f32 -1.442695, %v1262_v2  ;;  %v545_v46 = vadd.f32 %v533_v0, %v459_v7 }
  0xd1   : > { %v559_v45 = vpop.permute.xlu1 %558  ;;  %v781_v47 = vmul.f32 -1.442695, %v1264_v13  ;;  %v782_v48 = vmul.f32 -1.442695, %v1266_v10  ;;  %v783_v55 = vmul.f32 -1.442695, %v1268_v14  ;;  %v546_v56 = vadd.f32 %v534_v18, %v460_v8 }
  0xd2   : > { %874 = vpow2.f32 %v778_v40  ;;  %v547_v59 = vadd.f32 %v535_v19, %v461_v36  ;;  %v548_v25 = vadd.f32 %v536_v20, %v462_v32  ;;  %v549_v60 = vadd.f32 %v537_v21, %v463_v38 }
  0xd3   : > { %876 = vpow2.f32 %v779_v43  ;;  %v550_v26 = vadd.f32 %v538_v22, %v464_v39  ;;  %v1276_v29 = vadd.f32 %v559_v45, %v545_v46  ;;  %v1278_v30 = vadd.f32 %v559_v45, %v546_v56 }
  0xd4   : > { %878 = vpow2.f32 %v780_v44  ;;  %v1280_v31 = vadd.f32 %v559_v45, %v547_v59  ;;  %v1282_v37 = vadd.f32 %v559_v45, %v548_v25  ;;  %v1284_v41 = vadd.f32 %v559_v45, %v549_v60 }
  0xd5   : > { %880 = vpow2.f32 %v781_v47  ;;  %v1286_v42 = vadd.f32 %v559_v45, %v550_v26  ;;  %v784_v49 = vmul.f32 -1.442695, %v1276_v29  ;;  %v785_v50 = vmul.f32 -1.442695, %v1278_v30 }
  0xd6   : > { %882 = vpow2.f32 %v782_v48  ;;  %v786_v51 = vmul.f32 -1.442695, %v1280_v31  ;;  %v787_v52 = vmul.f32 -1.442695, %v1282_v37  ;;  %v788_v61 = vmul.f32 -1.442695, %v1284_v41 }
  0xd7   : > { %884 = vpow2.f32 %v783_v55  ;;  %v789_v62 = vmul.f32 -1.442695, %v1286_v42 }
  0xd8   : > { %886 = vpow2.f32 %v784_v49 }
  0xd9   : > { %888 = vpow2.f32 %v785_v50 }
  0xda   : > { %890 = vpow2.f32 %v786_v51 }
  0xdb   : > { %892 = vpow2.f32 %v787_v52 }
  0xdc   : > { %v875_v3 = vpop.eup %874  ;;  %894 = vpow2.f32 %v788_v61 }
  0xdd   : > { %v877_v4 = vpop.eup %876  ;;  %v609_v5 = vadd.f32 1.0, %v875_v3  ;;  %896 = vpow2.f32 %v789_v62 }
  0xde   : > { %v879_v6 = vpop.eup %878  ;;  %v610_v7 = vadd.f32 1.0, %v877_v4 }
  0xdf   : > { %v881_v8 = vpop.eup %880  ;;  %v611_v11 = vadd.f32 1.0, %v879_v6  ;;  %898 = vrcp.f32 %v609_v5 }
  0xe0   : > { %v883_v12 = vpop.eup %882  ;;  %v612_v15 = vadd.f32 1.0, %v881_v8  ;;  %900 = vrcp.f32 %v610_v7 }
  0xe1   : > { %v885_v16 = vpop.eup %884  ;;  %v613_v17 = vadd.f32 1.0, %v883_v12  ;;  %902 = vrcp.f32 %v611_v11 }
  0xe2   : > { %v887_v53 = vpop.eup %886  ;;  %v614_v54 = vadd.f32 1.0, %v885_v16  ;;  %904 = vrcp.f32 %v612_v15 }
  0xe3   : > { %v889_v57 = vpop.eup %888  ;;  %906 = vrcp.f32 %v613_v17  ;;  %v615_v58 = vadd.f32 1.0, %v887_v53 }
  0xe4   : > { %v891_v63 = vpop.eup %890  ;;  %908 = vrcp.f32 %v614_v54  ;;  %v616_v0 = vadd.f32 1.0, %v889_v57 }
  0xe5   : > { %v893_v18 = vpop.eup %892  ;;  %v617_v19 = vadd.f32 1.0, %v891_v63  ;;  %910 = vrcp.f32 %v615_v58 }
  0xe6   : > { %v895_v20 = vpop.eup %894  ;;  %v618_v21 = vadd.f32 1.0, %v893_v18  ;;  %912 = vrcp.f32 %v616_v0 }
  0xe7   : > { %v897_v22 = vpop.eup %896  ;;  %v619_v23 = vadd.f32 1.0, %v895_v20  ;;  %914 = vrcp.f32 %v617_v19 }
  0xe8   : > { %v620_v24 = vadd.f32 1.0, %v897_v22  ;;  %916 = vrcp.f32 %v618_v21 }
  0xe9   : > { %v899_v27 = vpop.eup %898  ;;  %918 = vrcp.f32 %v619_v23 }
  0xea   : > { %v901_v28 = vpop.eup %900  ;;  %v645_v33 = vmul.f32 %v899_v27, %v1258_v1  ;;  %920 = vrcp.f32 %v620_v24 }
  0xeb   : > { %v903_v34 = vpop.eup %902  ;;  %v646_v35 = vmul.f32 %v901_v28, %v1260_v9 }
  0xec   : > { %v905_v36 = vpop.eup %904  ;;  %v647_v32 = vmul.f32 %v903_v34, %v1262_v2  ;;  %657 = vst [vmem:[%s1298_s28] sm:$0xff] %v645_v33 }
  0xed   : > { %v907_v38 = vpop.eup %906  ;;  %v648_v1 = vmul.f32 %v905_v36, %v1264_v13  ;;  %658 = vst [vmem:[%s1298_s28 + $0x8] sm:$0xff] %v646_v35 }
  0xee   : > { %v909_v39 = vpop.eup %908  ;;  %v649_v9 = vmul.f32 %v907_v38, %v1266_v10  ;;  %659 = vst [vmem:[%s1298_s28 + $0x10] sm:$0xff] %v647_v32 }
  0xef   : > { %v911_v2 = vpop.eup %910  ;;  %v650_v40 = vmul.f32 %v909_v39, %v1268_v14  ;;  %660 = vst [vmem:[%s1298_s28 + $0x18] sm:$0xff] %v648_v1 }
  0xf0   : > { %v913_v43 = vpop.eup %912  ;;  %661 = vst [vmem:[%s1298_s28 + $0x20] sm:$0xff] %v649_v9  ;;  %v651_v44 = vmul.f32 %v911_v2, %v1276_v29 }
  0xf1   : > { %v915_v13 = vpop.eup %914  ;;  %662 = vst [vmem:[%s1298_s28 + $0x28] sm:$0xff] %v650_v40  ;;  %v652_v45 = vmul.f32 %v913_v43, %v1278_v30 }
  0xf2   : > { %v917_v10 = vpop.eup %916  ;;  %v653_v46 = vmul.f32 %v915_v13, %v1280_v31  ;;  %663 = vst [vmem:[%s1298_s28 + $0x30] sm:$0xff] %v651_v44 }
  0xf3   : > { %v919_v14 = vpop.eup %918  ;;  %v654_v47 = vmul.f32 %v917_v10, %v1282_v37  ;;  %664 = vst [vmem:[%s1298_s28 + $0x38] sm:$0xff] %v652_v45 }
  0xf4   : > { %v921_v48 = vpop.eup %920  ;;  %v655_v55 = vmul.f32 %v919_v14, %v1284_v41  ;;  %665 = vst [vmem:[%s1298_s28 + $0x40] sm:$0xff] %v653_v46 }
  0xf5   : > { %v656_v56 = vmul.f32 %v921_v48, %v1286_v42  ;;  %666 = vst [vmem:[%s1298_s28 + $0x48] sm:$0xff] %v654_v47 }
  0xf6   : > { %667 = vst [vmem:[%s1298_s28 + $0x50] sm:$0xff] %v655_v55 }
  0xf7   : > { %668 = vst [vmem:[%s1298_s28 + $0x58] sm:$0xff] %v656_v56 }
  0xf8   : > { %965 = shalt.err (!%p962_p4)
}
  0xf9   : > { %s966_s10 = scalar_lea.hbm %s1322_s8, 1536  ;;  %s970_s21 = scalar_lea.hbm %s1380_s3, 3072 }
  0xfa   : > { %p967_p6 = scmp.ne.s32.totalorder %s1322_s8, %s966_s10  ;;  %p971_p12 = scmp.lt.u32.totalorder %s1322_s8, %s1380_s3 }
  0xfb   : > { %p972_p1 = scmp.lt.u32.totalorder %s970_s21, %s966_s10  ;;  %p974_p8 = scmp.lt.u32.totalorder %s966_s10, %s1322_s8 }
  0xfc   : > { %p968_p7 = pnand %p967_p6, %p1388_p9 }
  0xfd   : > { %p973_p3 = por %p972_p1, %p971_p12 }
  0xfe   : > { %p969_p10 = pneg %p968_p7 }
  0xff   : > { %p975_p11 = por %p974_p8, %p973_p3 }
 0x101   : > { %p976_p0 = pnand %p975_p11, %p969_p10 }
 0x103   : > { %979 = shalt.err (!%p976_p0)
}
 0x104   : > { %s1042_s28 = smov 768   ;;  %s1043_s29 = smov 48  }
 0x105   : > { %800 = dma.vmem_to_hbm [thread:$0]  (%p1388_p9), %s1326_s30, 1536, %s1322_s8, %s670_s11, %s1042_s28, %s1042_s28, %s1043_s29  }
 0x106 PF: > { %s700_s15 = sand.u32 1, %s1014_s12   ;;  %p1389_p5 = scmp.ne.s32.totalorder %s1385_s27, 0 }
 0x107   : > { %p1390_p13 = scmp.ge.s32.totalorder %s1034_s17, 2  ;;  %s701_s5 = scalar_lea.sflag [#allocation4], %s700_s15 }
 0x109   : > { %p807_p2 = pnand %p1390_p13, %p1389_p5 }
 0x10b   : > { %1009 = dma.done.wait (!%p807_p2), %s701_s5, 1536  }
 0x10c   : > { %1011 = vsyncadd (!%p807_p2), %s701_s5, 4294965760  ;;  %s19_s17 = sadd.s32 1, %s1034_s17   ;;  %s1391_s12 = smov %s1018_s13 }
 0x10d   : > { %p16_p4 = scmp.ge.s32.totalorder %s19_s17, 4   ;;  %s1392_s13 = smov %s1022_s14 }
 0x10e   : > { %s1393_s14 = smov %s1120_s26  ;;  %s1394_s15 = smov %s1030_s16 }
 0x10f   : > { %s1395_s16 = smov %s1397_s20  ;;  %18 = sbr.rel (!%p16_p4) target bundleno = 6 (0x6), region = 77 }
 0x116   :  { %706 = vsyncpa [#allocation3], 1 }
 0x117   :  { %708 = vsyncpa [#allocation3 + $0x1], 1 }
 0x118   :  { %709 = vsyncpa [#allocation4], 1 }
 0x119   :  { %711 = vsyncpa [#allocation4 + $0x1], 1 }

</bundles_post_ra>
